<compile_context>
chip_gen: v6e
topology: v6e:2x2x1
jax: 0.10.0
libtpu: 0.0.40
codegen_flags: <defaults>
</compile_context>

<pallas_src>
import functools

import jax
import jax.numpy as jnp
from jax import lax
from jax.experimental import pallas as pl
from jax.experimental.pallas import tpu as pltpu

EPS = 1e-5


def _residual_block_kernel(x_ref, w1_ref, w2_ref, gmat_ref,
                           g1_ref, b1_ref, g2_ref, b2_ref,
                           o_ref, xpad_ref, *, N, H, W, C):
    # x_ref   : (N*H, W*C)    f32   packed input (also the residual)
    # w*_ref  : (3, W*C, W*C) bf16  banded conv weights, one band per ky
    # gmat_ref: (W*C, W*C)    f32   gmat[i, j] = 1 if i % C == j % C else 0
    # g*/b*   : (1, W*C)      f32   BN gamma/beta tiled across the W lane-groups
    # o_ref   : (N*H, W*C)    f32   output (lane-dense 2-D slab)
    # xpad_ref: (N, Hp, W*C)  bf16  y-halo padded activation scratch
    NH, WC = o_ref.shape
    inv_n = 1.0 / float(N * H * W)

    # Zero only the two halo rows the ky = 0 / ky = 2 matmuls read; the interior
    # rows [1, H] are fully overwritten before each conv and rows beyond H + 1
    # are never read.
    xpad_ref[:, 0:1, :] = jnp.zeros((N, 1, WC), dtype=xpad_ref.dtype)
    xpad_ref[:, H + 1:H + 2, :] = jnp.zeros((N, 1, WC), dtype=xpad_ref.dtype)

    def conv3x3(act, wb_ref):
        # act: (N*H, W*C) f32.  One bf16 interior write, then three banded
        # (N*H, W*C) x (W*C, W*C) MXU matmuls (ky = 0, 1, 2) accumulated in f32.
        # The kx taps and the x-boundary are folded into the banded weights, so
        # no per-tap im2col copies and no x-padding are needed.
        xpad_ref[:, 1:H + 1, :] = act.reshape(N, H, WC).astype(jnp.bfloat16)
        out = None
        for ky in range(3):
            lhs = xpad_ref[:, ky:ky + H, :].reshape(NH, WC)
            p = jnp.dot(lhs, wb_ref[ky], preferred_element_type=jnp.float32)
            out = p if out is None else out + p
        return out

    def bn_train(y, g_p, b_p):
        # Training-mode BatchNorm2d: biased batch stats over N*H*W, all f32.
        # Two-pass (mean, then centered variance) -> no E[x^2]-mean^2
        # cancellation.  Channel c occupies lanes {x*C + c}; multiplying a
        # (1, W*C) row-sum by gmat yields the per-channel total already
        # broadcast across the W lane-groups (stays lane-dense, no reshape).
        s = jnp.sum(y, axis=0, keepdims=True)
        mean = jnp.dot(s, gmat_ref[...],
                       preferred_element_type=jnp.float32) * inv_n
        d = y - mean
        ss = jnp.sum(d * d, axis=0, keepdims=True)
        var = jnp.dot(ss, gmat_ref[...],
                      preferred_element_type=jnp.float32) * inv_n
        return d * (g_p * lax.rsqrt(var + EPS)) + b_p

    h = conv3x3(x_ref[...], w1_ref)                                 # conv1
    h = jnp.maximum(bn_train(h, g1_ref[...], b1_ref[...]), 0.0)     # bn1 + relu
    h = conv3x3(h, w2_ref)                                          # conv2
    h = bn_train(h, g2_ref[...], b2_ref[...])                       # bn2
    # Residual + ReLU; x_ref is re-read here rather than held live across both
    # convs (lower VMEM / vreg pressure).
    o_ref[...] = jnp.maximum(h + x_ref[...], 0.0)


def residual_block(x_nchw, w1_oihw, w2_oihw, g1, b1, g2, b2):
    """PyTorch NCHW/OIHW -> packed-lane Pallas kernel -> NCHW."""
    N, C, H, W = x_nchw.shape
    WC, NH = W * C, N * H
    Hp = ((H + 2 + 15) // 16) * 16            # bf16 sublane-multiple padding

    # Packed-lane layout: rows = (n, y), lanes = (x, c).
    x_p = jnp.transpose(x_nchw, (0, 2, 3, 1)).astype(jnp.float32).reshape(NH, WC)

    def prep_wband(w_oihw):
        # (Co, Ci, 3, 3) -> three banded (W*Cin, W*Cout) matrices, one per ky:
        #   band[ky][(xi, ci), (xo, co)] = w[ky, xi - xo + 1, ci, co]
        # for xi - xo + 1 in {0, 1, 2}, else 0.  Out-of-range xi never appear,
        # which is exactly the x zero-padding of the conv.
        w = jnp.transpose(w_oihw, (2, 3, 1, 0)).astype(jnp.float32)  # (ky,kx,ci,co)
        xi = jnp.arange(W)[:, None]
        xo = jnp.arange(W)[None, :]
        kx = xi - xo + 1                                             # (W, W)
        valid = ((kx >= 0) & (kx <= 2)).astype(jnp.float32)
        band = w[:, jnp.clip(kx, 0, 2)] * valid[None, :, :, None, None]
        band = jnp.transpose(band, (0, 1, 3, 2, 4))                  # (3,xi,ci,xo,co)
        return band.reshape(3, WC, WC).astype(jnp.bfloat16)

    w1b, w2b = prep_wband(w1_oihw), prep_wband(w2_oihw)

    # Per-channel gamma/beta tiled across the W lane-groups: lane x*C+c -> p[c].
    def tile_param(p):
        return jnp.tile(p.astype(jnp.float32).reshape(1, C), (1, W))

    g1p, b1p, g2p, b2p = map(tile_param, (g1, b1, g2, b2))

    # Lane-group reduce/broadcast matrix for the per-channel BN statistics.
    lane = jnp.arange(WC)
    gmat = (lane[:, None] % C == lane[None, :] % C).astype(jnp.float32)

    # VMEM budget from actual buffer bytes plus headroom for activation-sized
    # f32 temporaries; capped at 75% of per-core VMEM (v5e/v6e 128 MiB, v7x 64).
    buf_bytes = (2 * NH * WC * 4              # x + out (f32)
                 + 2 * 3 * WC * WC * 2        # banded conv weights (bf16)
                 + WC * WC * 4                # gmat (f32)
                 + 4 * WC * 4                 # gamma / beta (f32)
                 + N * Hp * WC * 2)           # padded-activation scratch (bf16)
    budget = buf_bytes + 8 * NH * WC * 4
    try:
        vmem_cap = pltpu.get_tpu_info().vmem_capacity_bytes
    except Exception:
        vmem_cap = 64 * 1024 * 1024           # v7x per-core size as a safe floor
    vmem_limit = int(min(0.75 * vmem_cap, max(16 * 1024 * 1024, 2 * budget)))

    kernel = functools.partial(_residual_block_kernel, N=N, H=H, W=W, C=C)
    out_p = pl.pallas_call(
        kernel,
        out_shape=jax.ShapeDtypeStruct((NH, WC), jnp.float32),
        in_specs=[pl.BlockSpec(memory_space=pltpu.MemorySpace.VMEM)] * 8,
        out_specs=pl.BlockSpec(memory_space=pltpu.MemorySpace.VMEM),
        scratch_shapes=[pltpu.VMEM((N, Hp, WC), jnp.bfloat16)],
        compiler_params=pltpu.CompilerParams(vmem_limit_bytes=vmem_limit),
    )(x_p, w1b, w2b, gmat, g1p, b1p, g2p, b2p)

    out = out_p.reshape(N, H, W, C)                 # unpack lanes -> (x, c)
    return jnp.transpose(out, (0, 3, 1, 2))         # back to NCHW


def reference(x_nchw, w1, w2, g1, b1, g2, b2):
    """Pure-JAX f32 reference (same training-mode BN semantics)."""
    def conv(x, w):
        return lax.conv_general_dilated(
            x, w, window_strides=(1, 1), padding=((1, 1), (1, 1)),
            dimension_numbers=("NCHW", "OIHW", "NCHW"))

    def bn(y, g, b):
        mean = jnp.mean(y, axis=(0, 2, 3), keepdims=True)
        var = jnp.mean((y - mean) ** 2, axis=(0, 2, 3), keepdims=True)
        return ((y - mean) / jnp.sqrt(var + EPS)) * g.reshape(1, -1, 1, 1) \
            + b.reshape(1, -1, 1, 1)

    h = jax.nn.relu(bn(conv(x_nchw, w1), g1, b1))
    h = bn(conv(h, w2), g2, b2)
    return jax.nn.relu(h + x_nchw)


if __name__ == "__main__":
    key = jax.random.PRNGKey(0)
    k_x, k_w1, k_w2, k_g1, k_b1, k_g2, k_b2 = jax.random.split(key, 7)

    N, C, H, W = 2, 8, 16, 16                      # NCHW; W*C = 128 (lane-dense)
    x = jax.random.normal(k_x, (N, C, H, W), jnp.float32)

    # Conv2d(C, C, 3, padding=1, bias=False) weights, OIHW.
    w1 = jax.random.normal(k_w1, (C, C, 3, 3), jnp.float32) * 0.1
    w2 = jax.random.normal(k_w2, (C, C, 3, 3), jnp.float32) * 0.1
    # BatchNorm2d affine params (perturbed from the default init so the affine
    # path is actually exercised).
    g1 = 1.0 + 0.1 * jax.random.normal(k_g1, (C,), jnp.float32)
    b1 = 0.1 * jax.random.normal(k_b1, (C,), jnp.float32)
    g2 = 1.0 + 0.1 * jax.random.normal(k_g2, (C,), jnp.float32)
    b2 = 0.1 * jax.random.normal(k_b2, (C,), jnp.float32)

    out = jax.block_until_ready(residual_block(x, w1, w2, g1, b1, g2, b2))
    ref = reference(x, w1, w2, g1, b1, g2, b2)

    assert out.shape == x.shape
    # Tolerance accounts for bf16 MXU operands (f32 accumulation, f32 BN).
    max_err = float(jnp.max(jnp.abs(out - ref)))
    assert jnp.allclose(out, ref, atol=2e-2, rtol=2e-2), f"max_err={max_err}"
    print("KERNEL_OK")
</pallas_src>

<mosaic_0001>
module attributes {stable_mosaic.version = 11 : i64} {
  func.func @_residual_block_kernel(%arg0: memref<32x128xf32, #tpu.memory_space<vmem>>, %arg1: memref<3x128x128xbf16, #tpu.memory_space<vmem>>, %arg2: memref<3x128x128xbf16, #tpu.memory_space<vmem>>, %arg3: memref<128x128xf32, #tpu.memory_space<vmem>>, %arg4: memref<1x128xf32, #tpu.memory_space<vmem>>, %arg5: memref<1x128xf32, #tpu.memory_space<vmem>>, %arg6: memref<1x128xf32, #tpu.memory_space<vmem>>, %arg7: memref<1x128xf32, #tpu.memory_space<vmem>>, %arg8: memref<32x128xf32, #tpu.memory_space<vmem>>, %arg9: memref<2x32x128xbf16, #tpu.memory_space<vmem>>) attributes {dimension_semantics = [], scalar_prefetch = 0 : i64, scratch_operands = 1 : i64, tpu.core_type = #tpu.core_type<tc>} {
    %cst = arith.constant 0.000000e+00 : bf16
    %0 = vector.broadcast %cst : bf16 to vector<2x1x128xbf16>
    %c0 = arith.constant 0 : index
    %c0_0 = arith.constant 0 : index
    %c0_1 = arith.constant 0 : index
    %1 = vector.load %arg9[%c0, %c0_0, %c0_1] : memref<2x32x128xbf16, #tpu.memory_space<vmem>>, vector<2x1x128xbf16>
    tpu.vector_store %arg9[%c0, %c0_0, %c0_1], %0 {strides = array<i32>} : memref<2x32x128xbf16, #tpu.memory_space<vmem>>, vector<2x1x128xbf16>,
    %cst_2 = arith.constant 0.000000e+00 : bf16
    %2 = vector.broadcast %cst_2 : bf16 to vector<2x1x128xbf16>
    %c0_3 = arith.constant 0 : index
    %c17 = arith.constant 17 : index
    %c0_4 = arith.constant 0 : index
    %3 = vector.load %arg9[%c0_3, %c17, %c0_4] : memref<2x32x128xbf16, #tpu.memory_space<vmem>>, vector<2x1x128xbf16>
    tpu.vector_store %arg9[%c0_3, %c17, %c0_4], %2 {strides = array<i32>} : memref<2x32x128xbf16, #tpu.memory_space<vmem>>, vector<2x1x128xbf16>,
    %c0_5 = arith.constant 0 : index
    %c0_6 = arith.constant 0 : index
    %4 = vector.load %arg0[%c0_5, %c0_6] : memref<32x128xf32, #tpu.memory_space<vmem>>, vector<32x128xf32>
    %5 = vector.shape_cast %4 : vector<32x128xf32> to vector<2x16x128xf32>
    %6 = arith.truncf %5 : vector<2x16x128xf32> to vector<2x16x128xbf16>
    %c0_7 = arith.constant 0 : index
    %c1 = arith.constant 1 : index
    %c0_8 = arith.constant 0 : index
    %7 = vector.load %arg9[%c0_7, %c1, %c0_8] : memref<2x32x128xbf16, #tpu.memory_space<vmem>>, vector<2x16x128xbf16>
    tpu.vector_store %arg9[%c0_7, %c1, %c0_8], %6 {strides = array<i32>} : memref<2x32x128xbf16, #tpu.memory_space<vmem>>, vector<2x16x128xbf16>,
    %c0_9 = arith.constant 0 : index
    %c0_10 = arith.constant 0 : index
    %c0_11 = arith.constant 0 : index
    %8 = vector.load %arg9[%c0_9, %c0_10, %c0_11] : memref<2x32x128xbf16, #tpu.memory_space<vmem>>, vector<2x16x128xbf16>
    %9 = vector.shape_cast %8 : vector<2x16x128xbf16> to vector<32x128xbf16>
    %c0_12 = arith.constant 0 : index
    %c0_13 = arith.constant 0 : index
    %c0_14 = arith.constant 0 : index
    %10 = vector.load %arg1[%c0_12, %c0_13, %c0_14] : memref<3x128x128xbf16, #tpu.memory_space<vmem>>, vector<1x128x128xbf16>
    %11 = vector.shape_cast %10 : vector<1x128x128xbf16> to vector<128x128xbf16>
    %cst_15 = arith.constant dense<0.000000e+00> : vector<32x128xf32>
    %12 = tpu.matmul %9, %11, %cst_15 {dimension_numbers = #tpu.dot_dimension_numbers<[1], [0], [0], [1], [0, 0, 1, 1], [], []>} : vector<32x128xbf16>, vector<128x128xbf16>, vector<32x128xf32> -> vector<32x128xf32>
    %c0_16 = arith.constant 0 : index
    %c1_17 = arith.constant 1 : index
    %c0_18 = arith.constant 0 : index
    %13 = vector.load %arg9[%c0_16, %c1_17, %c0_18] : memref<2x32x128xbf16, #tpu.memory_space<vmem>>, vector<2x16x128xbf16>
    %14 = vector.shape_cast %13 : vector<2x16x128xbf16> to vector<32x128xbf16>
    %c1_19 = arith.constant 1 : index
    %c0_20 = arith.constant 0 : index
    %c0_21 = arith.constant 0 : index
    %15 = vector.load %arg1[%c1_19, %c0_20, %c0_21] : memref<3x128x128xbf16, #tpu.memory_space<vmem>>, vector<1x128x128xbf16>
    %16 = vector.shape_cast %15 : vector<1x128x128xbf16> to vector<128x128xbf16>
    %cst_22 = arith.constant dense<0.000000e+00> : vector<32x128xf32>
    %17 = tpu.matmul %14, %16, %cst_22 {dimension_numbers = #tpu.dot_dimension_numbers<[1], [0], [0], [1], [0, 0, 1, 1], [], []>} : vector<32x128xbf16>, vector<128x128xbf16>, vector<32x128xf32> -> vector<32x128xf32>
    %18 = arith.addf %12, %17 : vector<32x128xf32>
    %c0_23 = arith.constant 0 : index
    %c2 = arith.constant 2 : index
    %c0_24 = arith.constant 0 : index
    %19 = vector.load %arg9[%c0_23, %c2, %c0_24] : memref<2x32x128xbf16, #tpu.memory_space<vmem>>, vector<2x16x128xbf16>
    %20 = vector.shape_cast %19 : vector<2x16x128xbf16> to vector<32x128xbf16>
    %c2_25 = arith.constant 2 : index
    %c0_26 = arith.constant 0 : index
    %c0_27 = arith.constant 0 : index
    %21 = vector.load %arg1[%c2_25, %c0_26, %c0_27] : memref<3x128x128xbf16, #tpu.memory_space<vmem>>, vector<1x128x128xbf16>
    %22 = vector.shape_cast %21 : vector<1x128x128xbf16> to vector<128x128xbf16>
    %cst_28 = arith.constant dense<0.000000e+00> : vector<32x128xf32>
    %23 = tpu.matmul %20, %22, %cst_28 {dimension_numbers = #tpu.dot_dimension_numbers<[1], [0], [0], [1], [0, 0, 1, 1], [], []>} : vector<32x128xbf16>, vector<128x128xbf16>, vector<32x128xf32> -> vector<32x128xf32>
    %24 = arith.addf %18, %23 : vector<32x128xf32>
    %c0_29 = arith.constant 0 : index
    %c0_30 = arith.constant 0 : index
    %25 = vector.load %arg4[%c0_29, %c0_30] : memref<1x128xf32, #tpu.memory_space<vmem>>, vector<1x128xf32>
    %c0_31 = arith.constant 0 : index
    %c0_32 = arith.constant 0 : index
    %26 = vector.load %arg5[%c0_31, %c0_32] : memref<1x128xf32, #tpu.memory_space<vmem>>, vector<1x128xf32>
    %cst_33 = arith.constant dense<0.000000e+00> : vector<128xf32>
    %27 = vector.multi_reduction <add>, %24, %cst_33 [0] : vector<32x128xf32> to vector<128xf32>
    %28 = vector.shape_cast %27 : vector<128xf32> to vector<1x128xf32>
    %c0_34 = arith.constant 0 : index
    %c0_35 = arith.constant 0 : index
    %29 = vector.load %arg3[%c0_34, %c0_35] : memref<128x128xf32, #tpu.memory_space<vmem>>, vector<128x128xf32>
    %cst_36 = arith.constant dense<0.000000e+00> : vector<1x128xf32>
    %30 = tpu.matmul %28, %29, %cst_36 {dimension_numbers = #tpu.dot_dimension_numbers<[1], [0], [0], [1], [0, 0, 1, 1], [], []>} : vector<1x128xf32>, vector<128x128xf32>, vector<1x128xf32> -> vector<1x128xf32>
    %cst_37 = arith.constant 0.001953125 : f32
    %31 = vector.broadcast %cst_37 : f32 to vector<1x128xf32>
    %32 = arith.mulf %30, %31 : vector<1x128xf32>
    %33 = vector.broadcast %32 : vector<1x128xf32> to vector<32x128xf32>
    %34 = arith.subf %24, %33 : vector<32x128xf32>
    %35 = arith.mulf %34, %34 : vector<32x128xf32>
    %cst_38 = arith.constant dense<0.000000e+00> : vector<128xf32>
    %36 = vector.multi_reduction <add>, %35, %cst_38 [0] : vector<32x128xf32> to vector<128xf32>
    %37 = vector.shape_cast %36 : vector<128xf32> to vector<1x128xf32>
    %c0_39 = arith.constant 0 : index
    %c0_40 = arith.constant 0 : index
    %38 = vector.load %arg3[%c0_39, %c0_40] : memref<128x128xf32, #tpu.memory_space<vmem>>, vector<128x128xf32>
    %cst_41 = arith.constant dense<0.000000e+00> : vector<1x128xf32>
    %39 = tpu.matmul %37, %38, %cst_41 {dimension_numbers = #tpu.dot_dimension_numbers<[1], [0], [0], [1], [0, 0, 1, 1], [], []>} : vector<1x128xf32>, vector<128x128xf32>, vector<1x128xf32> -> vector<1x128xf32>
    %cst_42 = arith.constant 0.001953125 : f32
    %40 = vector.broadcast %cst_42 : f32 to vector<1x128xf32>
    %41 = arith.mulf %39, %40 : vector<1x128xf32>
    %cst_43 = arith.constant 9.99999974E-6 : f32
    %42 = vector.broadcast %cst_43 : f32 to vector<1x128xf32>
    %43 = arith.addf %41, %42 : vector<1x128xf32>
    %44 = math.rsqrt %43 : vector<1x128xf32>
    %45 = arith.mulf %25, %44 : vector<1x128xf32>
    %46 = vector.broadcast %45 : vector<1x128xf32> to vector<32x128xf32>
    %47 = arith.mulf %34, %46 : vector<32x128xf32>
    %48 = vector.broadcast %26 : vector<1x128xf32> to vector<32x128xf32>
    %49 = arith.addf %47, %48 : vector<32x128xf32>
    %cst_44 = arith.constant 0.000000e+00 : f32
    %50 = vector.broadcast %cst_44 : f32 to vector<32x128xf32>
    %51 = arith.maximumf %49, %50 : vector<32x128xf32>
    %52 = vector.shape_cast %51 : vector<32x128xf32> to vector<2x16x128xf32>
    %53 = arith.truncf %52 : vector<2x16x128xf32> to vector<2x16x128xbf16>
    %c0_45 = arith.constant 0 : index
    %c1_46 = arith.constant 1 : index
    %c0_47 = arith.constant 0 : index
    %54 = vector.load %arg9[%c0_45, %c1_46, %c0_47] : memref<2x32x128xbf16, #tpu.memory_space<vmem>>, vector<2x16x128xbf16>
    tpu.vector_store %arg9[%c0_45, %c1_46, %c0_47], %53 {strides = array<i32>} : memref<2x32x128xbf16, #tpu.memory_space<vmem>>, vector<2x16x128xbf16>,
    %c0_48 = arith.constant 0 : index
    %c0_49 = arith.constant 0 : index
    %c0_50 = arith.constant 0 : index
    %55 = vector.load %arg9[%c0_48, %c0_49, %c0_50] : memref<2x32x128xbf16, #tpu.memory_space<vmem>>, vector<2x16x128xbf16>
    %56 = vector.shape_cast %55 : vector<2x16x128xbf16> to vector<32x128xbf16>
    %c0_51 = arith.constant 0 : index
    %c0_52 = arith.constant 0 : index
    %c0_53 = arith.constant 0 : index
    %57 = vector.load %arg2[%c0_51, %c0_52, %c0_53] : memref<3x128x128xbf16, #tpu.memory_space<vmem>>, vector<1x128x128xbf16>
    %58 = vector.shape_cast %57 : vector<1x128x128xbf16> to vector<128x128xbf16>
    %cst_54 = arith.constant dense<0.000000e+00> : vector<32x128xf32>
    %59 = tpu.matmul %56, %58, %cst_54 {dimension_numbers = #tpu.dot_dimension_numbers<[1], [0], [0], [1], [0, 0, 1, 1], [], []>} : vector<32x128xbf16>, vector<128x128xbf16>, vector<32x128xf32> -> vector<32x128xf32>
    %c0_55 = arith.constant 0 : index
    %c1_56 = arith.constant 1 : index
    %c0_57 = arith.constant 0 : index
    %60 = vector.load %arg9[%c0_55, %c1_56, %c0_57] : memref<2x32x128xbf16, #tpu.memory_space<vmem>>, vector<2x16x128xbf16>
    %61 = vector.shape_cast %60 : vector<2x16x128xbf16> to vector<32x128xbf16>
    %c1_58 = arith.constant 1 : index
    %c0_59 = arith.constant 0 : index
    %c0_60 = arith.constant 0 : index
    %62 = vector.load %arg2[%c1_58, %c0_59, %c0_60] : memref<3x128x128xbf16, #tpu.memory_space<vmem>>, vector<1x128x128xbf16>
    %63 = vector.shape_cast %62 : vector<1x128x128xbf16> to vector<128x128xbf16>
    %cst_61 = arith.constant dense<0.000000e+00> : vector<32x128xf32>
    %64 = tpu.matmul %61, %63, %cst_61 {dimension_numbers = #tpu.dot_dimension_numbers<[1], [0], [0], [1], [0, 0, 1, 1], [], []>} : vector<32x128xbf16>, vector<128x128xbf16>, vector<32x128xf32> -> vector<32x128xf32>
    %65 = arith.addf %59, %64 : vector<32x128xf32>
    %c0_62 = arith.constant 0 : index
    %c2_63 = arith.constant 2 : index
    %c0_64 = arith.constant 0 : index
    %66 = vector.load %arg9[%c0_62, %c2_63, %c0_64] : memref<2x32x128xbf16, #tpu.memory_space<vmem>>, vector<2x16x128xbf16>
    %67 = vector.shape_cast %66 : vector<2x16x128xbf16> to vector<32x128xbf16>
    %c2_65 = arith.constant 2 : index
    %c0_66 = arith.constant 0 : index
    %c0_67 = arith.constant 0 : index
    %68 = vector.load %arg2[%c2_65, %c0_66, %c0_67] : memref<3x128x128xbf16, #tpu.memory_space<vmem>>, vector<1x128x128xbf16>
    %69 = vector.shape_cast %68 : vector<1x128x128xbf16> to vector<128x128xbf16>
    %cst_68 = arith.constant dense<0.000000e+00> : vector<32x128xf32>
    %70 = tpu.matmul %67, %69, %cst_68 {dimension_numbers = #tpu.dot_dimension_numbers<[1], [0], [0], [1], [0, 0, 1, 1], [], []>} : vector<32x128xbf16>, vector<128x128xbf16>, vector<32x128xf32> -> vector<32x128xf32>
    %71 = arith.addf %65, %70 : vector<32x128xf32>
    %c0_69 = arith.constant 0 : index
    %c0_70 = arith.constant 0 : index
    %72 = vector.load %arg6[%c0_69, %c0_70] : memref<1x128xf32, #tpu.memory_space<vmem>>, vector<1x128xf32>
    %c0_71 = arith.constant 0 : index
    %c0_72 = arith.constant 0 : index
    %73 = vector.load %arg7[%c0_71, %c0_72] : memref<1x128xf32, #tpu.memory_space<vmem>>, vector<1x128xf32>
    %cst_73 = arith.constant dense<0.000000e+00> : vector<128xf32>
    %74 = vector.multi_reduction <add>, %71, %cst_73 [0] : vector<32x128xf32> to vector<128xf32>
    %75 = vector.shape_cast %74 : vector<128xf32> to vector<1x128xf32>
    %c0_74 = arith.constant 0 : index
    %c0_75 = arith.constant 0 : index
    %76 = vector.load %arg3[%c0_74, %c0_75] : memref<128x128xf32, #tpu.memory_space<vmem>>, vector<128x128xf32>
    %cst_76 = arith.constant dense<0.000000e+00> : vector<1x128xf32>
    %77 = tpu.matmul %75, %76, %cst_76 {dimension_numbers = #tpu.dot_dimension_numbers<[1], [0], [0], [1], [0, 0, 1, 1], [], []>} : vector<1x128xf32>, vector<128x128xf32>, vector<1x128xf32> -> vector<1x128xf32>
    %cst_77 = arith.constant 0.001953125 : f32
    %78 = vector.broadcast %cst_77 : f32 to vector<1x128xf32>
    %79 = arith.mulf %77, %78 : vector<1x128xf32>
    %80 = vector.broadcast %79 : vector<1x128xf32> to vector<32x128xf32>
    %81 = arith.subf %71, %80 : vector<32x128xf32>
    %82 = arith.mulf %81, %81 : vector<32x128xf32>
    %cst_78 = arith.constant dense<0.000000e+00> : vector<128xf32>
    %83 = vector.multi_reduction <add>, %82, %cst_78 [0] : vector<32x128xf32> to vector<128xf32>
    %84 = vector.shape_cast %83 : vector<128xf32> to vector<1x128xf32>
    %c0_79 = arith.constant 0 : index
    %c0_80 = arith.constant 0 : index
    %85 = vector.load %arg3[%c0_79, %c0_80] : memref<128x128xf32, #tpu.memory_space<vmem>>, vector<128x128xf32>
    %cst_81 = arith.constant dense<0.000000e+00> : vector<1x128xf32>
    %86 = tpu.matmul %84, %85, %cst_81 {dimension_numbers = #tpu.dot_dimension_numbers<[1], [0], [0], [1], [0, 0, 1, 1], [], []>} : vector<1x128xf32>, vector<128x128xf32>, vector<1x128xf32> -> vector<1x128xf32>
    %cst_82 = arith.constant 0.001953125 : f32
    %87 = vector.broadcast %cst_82 : f32 to vector<1x128xf32>
    %88 = arith.mulf %86, %87 : vector<1x128xf32>
    %cst_83 = arith.constant 9.99999974E-6 : f32
    %89 = vector.broadcast %cst_83 : f32 to vector<1x128xf32>
    %90 = arith.addf %88, %89 : vector<1x128xf32>
    %91 = math.rsqrt %90 : vector<1x128xf32>
    %92 = arith.mulf %72, %91 : vector<1x128xf32>
    %93 = vector.broadcast %92 : vector<1x128xf32> to vector<32x128xf32>
    %94 = arith.mulf %81, %93 : vector<32x128xf32>
    %95 = vector.broadcast %73 : vector<1x128xf32> to vector<32x128xf32>
    %96 = arith.addf %94, %95 : vector<32x128xf32>
    %c0_84 = arith.constant 0 : index
    %c0_85 = arith.constant 0 : index
    %97 = vector.load %arg0[%c0_84, %c0_85] : memref<32x128xf32, #tpu.memory_space<vmem>>, vector<32x128xf32>
    %98 = arith.addf %96, %97 : vector<32x128xf32>
    %cst_86 = arith.constant 0.000000e+00 : f32
    %99 = vector.broadcast %cst_86 : f32 to vector<32x128xf32>
    %100 = arith.maximumf %98, %99 : vector<32x128xf32>
    %c0_87 = arith.constant 0 : index
    %c0_88 = arith.constant 0 : index
    %101 = vector.load %arg8[%c0_87, %c0_88] : memref<32x128xf32, #tpu.memory_space<vmem>>, vector<32x128xf32>
    tpu.vector_store %arg8[%c0_87, %c0_88], %100 {strides = array<i32>} : memref<32x128xf32, #tpu.memory_space<vmem>>, vector<32x128xf32>,
    return
  }
}

</mosaic_0001>

<bundles_post_ra>
// kernel: tpu_custom_call.1
= control target key start
LH: loop header
LB: loop body
LE: loop exit
PB: predicated region body
PF: predicated region fallthrough
CT: control target
= control target key end

     0   :  { %13 = vsyncpa [#allocation4], 0  ;;  %s2676_s0 = inlined_call_operand.hbm [shape: f32[32,128], index: 0, kind: input, shape index: {}]   ;;  %s2677_s1 = inlined_call_operand.hbm [shape: bf16[3,128,128], index: 1, kind: input, shape index: {}]   ;;  %s2678_s2 = inlined_call_operand.hbm [shape: bf16[3,128,128], index: 2, kind: input, shape index: {}]   ;;  %s2679_s3 = inlined_call_operand.hbm [shape: f32[128,128], index: 3, kind: input, shape index: {}]   ;;  %s2680_s4 = inlined_call_operand.vmem [shape: f32[1,128], index: 4, kind: input, shape index: {}]   ;;  %s2681_s5 = inlined_call_operand.vmem [shape: f32[1,128], index: 5, kind: input, shape index: {}]   ;;  %s2682_s6 = inlined_call_operand.vmem [shape: f32[1,128], index: 6, kind: input, shape index: {}]   ;;  %s2683_s7 = inlined_call_operand.vmem [shape: f32[1,128], index: 7, kind: input, shape index: {}]   ;;  %s2684_s8 = inlined_call_operand.hbm [shape: f32[32,128], index: 8, kind: output, shape index: {}]  }
   0x1   :  { %14 = vsyncpa [#allocation7], 0 }
   0x2   :  { %15 = vsyncpa [#allocation10], 0 }
   0x3   :  { %16 = vsyncpa [#allocation5], 0  ;;  %s2252_s27 = smov [#allocation6]  }
   0x4   :  { %s34_s28 = sshll.u32 %s2252_s27, 4  ;;  %s35_s28 = int_to_ptr.vmem [resolvable:$true] %s34_s28 }
   0x5   :  { %s2152_s29 = scalar_lea.vmem %s35_s28, 3072  ;;  %p2157_p1 = scmp.lt.s32.totalorder %s35_s28, %s35_s28 }
   0x6   :  { %p2153_p0 = scmp.ne.s32.totalorder %s35_s28, %s2152_s29  ;;  %p2158_p2 = scmp.lt.s32.totalorder %s2152_s29, %s2152_s29 }
   0x8   :  { %p2159_p3 = por %p2158_p2, %p2157_p1 }
   0xa   :  { %p2160_p4 = pnand %p2159_p3, %p2153_p0 }
   0xc   :  { %2163 = shalt.err (!%p2160_p4)
}
   0xd   :  { %s2253_s30 = smov 64   ;;  %s2254_s9 = smov 4  }
   0xe   :  { %40 = dma.hbm_to_vmem [thread:$0]  %s2677_s1, 3072, %s35_s28, [#allocation7], %s2253_s30, %s2253_s30, %s2254_s9  }
   0xf   :  { %s2255_s12 = smov [#allocation3]  }
  0x10   :  { %s22_s13 = sshll.u32 %s2255_s12, 4  ;;  %s23_s13 = int_to_ptr.vmem [resolvable:$true] %s22_s13 }
  0x11   :  { %s2172_s14 = scalar_lea.vmem %s23_s13, 512  ;;  %p2177_p6 = scmp.lt.s32.totalorder %s23_s13, %s23_s13 }
  0x12   :  { %p2173_p5 = scmp.ne.s32.totalorder %s23_s13, %s2172_s14  ;;  %p2178_p7 = scmp.lt.s32.totalorder %s2172_s14, %s2172_s14 }
  0x14   :  { %p2179_p8 = por %p2178_p7, %p2177_p6 }
  0x16   :  { %p2180_p9 = pnand %p2179_p8, %p2173_p5 }
  0x18   :  { %2183 = shalt.err (!%p2180_p9)
}
  0x19   :  { %s2256_s15 = smov 128   ;;  %s2257_s16 = smov 8  }
  0x1a   :  { %28 = dma.hbm_to_vmem [thread:$0]  %s2676_s0, 512, %s23_s13, [#allocation4], %s2256_s15, %s2256_s15, %s2257_s16  }
  0x1b   :  { %s2258_s1 = smov [#allocation8]   ;;  %s2259_s20 = smov [#allocation9]  }
  0x1c   :  { %s46_s19 = sshll.u32 %s2258_s1, 4  ;;  %s58_s21 = sshll.u32 %s2259_s20, 4  ;;  %s47_s19 = int_to_ptr.vmem [resolvable:$true] %s46_s19  ;;  %s59_s21 = int_to_ptr.vmem [resolvable:$true] %s58_s21 }
  0x1d   :  { %s2192_s22 = scalar_lea.vmem %s47_s19, 3072  ;;  %p2197_p11 = scmp.lt.s32.totalorder %s47_s19, %s47_s19 }
  0x1e   :  { %p2193_p10 = scmp.ne.s32.totalorder %s47_s19, %s2192_s22  ;;  %p2198_p12 = scmp.lt.s32.totalorder %s2192_s22, %s2192_s22 }
  0x20   :  { %p2199_p13 = por %p2198_p12, %p2197_p11 }
  0x22   :  { %p2200_p0 = pnand %p2199_p13, %p2193_p10 }
  0x24   :  { %2203 = shalt.err (!%p2200_p0)
}
  0x25   :  { %52 = dma.hbm_to_vmem [thread:$0]  %s2678_s2, 3072, %s47_s19, [#allocation7], %s2253_s30, %s2253_s30, %s2254_s9  }
  0x26   :  { %s2212_s0 = scalar_lea.vmem %s59_s21, 2048  ;;  %p2217_p2 = scmp.lt.s32.totalorder %s59_s21, %s59_s21 }
  0x27   :  { %p2213_p1 = scmp.ne.s32.totalorder %s59_s21, %s2212_s0  ;;  %p2218_p3 = scmp.lt.s32.totalorder %s2212_s0, %s2212_s0 }
  0x29   :  { %p2219_p4 = por %p2218_p3, %p2217_p2 }
  0x2b   :  { %p2220_p5 = pnand %p2219_p4, %p2213_p1 }
  0x2d   :  { %2223 = shalt.err (!%p2220_p5)
}
  0x2e   :  { %64 = dma.hbm_to_vmem [thread:$0]  %s2679_s3, 2048, %s59_s21, [#allocation10], %s2256_s15, %s2256_s15, %s2257_s16  }
  0x2f   :  { %2244 = dma.done.wait [#allocation4], 512  }
  0x30   :  { %2245 = vsyncadd [#allocation4], 4294966784 }
  0x31   :  { %2246 = dma.done.wait [#allocation7], 6144  }
  0x32   :  { %2247 = vsyncadd [#allocation7], 4294961152 }
  0x33   :  { %2248 = dma.done.wait [#allocation10], 2048  }
  0x34   :  { %2249 = vsyncadd [#allocation10], 4294965248  ;;  %v2088_v0 = vld [vmem:[#allocation6 + $0x78] sm:$0xff]   ;;  %v2090_v2 = vld [vmem:[#allocation6 + $0x70] sm:$0xff]   ;;  %vm86_vm0 = vcmask 1040384   ;;  %vm161_vm6 = vcmask 1043456  }
  0x35   :  { %v2089_v1 = vld [vmem:[#allocation6 + $0x38] sm:$0xff]   ;;  %1817 = vmatprep.subr.bf16.mxu0 %v2088_v0  ;;  %v2091_v3 = vld [vmem:[#allocation6 + $0x30] sm:$0xff]   ;;  %v2092_v4 = vld [vmem:[#allocation6 + $0x68] sm:$0xff]   ;;  %vm87_vm1 = vsmask.f32 256  ;;  %vm487_vm11 = vcmask 1042432  }
  0x36   :  { %1837 = vmatprep.subr.bf16.mxu1 %v2089_v1  ;;  %1818 = vmatpush3.bf16.msra.mxu0 %v2088_v0  ;;  %v2093_v5 = vld [vmem:[#allocation6 + $0x28] sm:$0xff]   ;;  %vm95_vm2 = vsmask.f32 7938  ;;  %v2094_v6 = vld [vmem:[#allocation6 + $0x60] sm:$0xff]   ;;  %vm2333_vm3 = vmand %vm86_vm0, %vm87_vm1  ;;  %vm119_vm5 = vsmask.f32 4368 }
  0x37   :  { %1838 = vmatpush3.bf16.msra.mxu1 %v2089_v1  ;;  %1819 = vmatprep.subr.bf16.mxu0 %v2090_v2  ;;  %v2095_v7 = vld [vmem:[#allocation6 + $0x20] sm:$0xff]   ;;  %vm2338_vm4 = vmand %vm86_vm0, %vm95_vm2  ;;  %v2096_v10 = vld [vmem:[#allocation6 + $0x58] sm:$0xff]   ;;  %vm199_vm9 = vsmask.f32 3328  ;;  %vm200_vm10 = vsmask.f32 7440 }
  0x38   :  { %1839 = vmatprep.subr.bf16.mxu1 %v2091_v3  ;;  %v2097_v11 = vld [vmem:[#allocation6 + $0x18] sm:$0xff]   ;;  %v2098_v12 = vld [vmem:[#allocation6 + $0x50] sm:$0xff]   ;;  %v89_v14 = vld [vmem:[#allocation2] sm:$0x1]  ;;  %vm488_vm12 = vcmask 1046532   ;;  %vm2261_vm15 = vmmov 0  }
  0x39   :  { %v2099_v13 = vld [vmem:[#allocation6 + $0x10] sm:$0xff]   ;;  %v97_v15 = vld [vmem:[#allocation2 + $0x8] sm:$0x1]  ;;  %v103_v16 = vld [vmem:[#allocation3] sm:$0xff]  ;;  %v90_v17 = vsel %vm2333_vm3, 0, %v89_v14 }
  0x3a   :  { %1820 = vmatpush3.bf16.msra.mxu0 %v2090_v2  ;;  %v98_v18 = vsel %vm2338_vm4, 0, %v97_v15  ;;  %v104_v19 = vld [vmem:[#allocation3 + $0x8] sm:$0xff]  ;;  %v1681_v20 = vpack.c.bf16 %v103_v16, %v103_v16  ;;  %v92_v21 = vld [vmem:[#allocation2 + $0x10] sm:$0x1]  ;;  %91 = vst [vmem:[#allocation2] sm:$0x1] %v90_v17  ;;  %vm2352_vm7 = vmor %vm87_vm1, %vm119_vm5 }
  0x3b   :  { %1840 = vmatpush3.bf16.msra.mxu1 %v2091_v3  ;;  %1821 = vmatprep.subr.bf16.mxu0 %v2092_v4  ;;  %v105_v22 = vld [vmem:[#allocation3 + $0x10] sm:$0xff]  ;;  %99 = vst [vmem:[#allocation2 + $0x8] sm:$0x1] %v98_v18  ;;  %v1682_v23 = vpack.c.bf16 %v104_v19, %v104_v19  ;;  %v93_v24 = vsel %vm2333_vm3, 0, %v92_v21  ;;  %v100_v25 = vld [vmem:[#allocation2 + $0x18] sm:$0x1]  ;;  %vm2358_vm8 = vmand %vm161_vm6, %vm95_vm2 }
  0x3c   :  { %1841 = vmatprep.subr.bf16.mxu1 %v2093_v5  ;;  %v106_v26 = vld [vmem:[#allocation3 + $0x18] sm:$0xff]  ;;  %v1683_v27 = vpack.c.bf16 %v105_v22, %v105_v22  ;;  %v2100_v28 = vld [vmem:[#allocation6 + $0x48] sm:$0xff]   ;;  %v122_v29 = vshrl.u32 %v1681_v20, 16  ;;  %v125_v30 = vshll.u32 %v1681_v20, 16  ;;  %94 = vst [vmem:[#allocation2 + $0x10] sm:$0x1] %v93_v24  ;;  %vm2391_vm13 = vmor %vm199_vm9, %vm200_vm10 }
  0x3d   :  { %v101_v31 = vsel %vm2338_vm4, 0, %v100_v25  ;;  %v1684_v32 = vpack.c.bf16 %v106_v26, %v106_v26  ;;  %v130_v33 = vshrl.u32 %v1682_v23, 16  ;;  %v133_v34 = vshll.u32 %v1682_v23, 16  ;;  %v2101_v37 = vld [vmem:[#allocation6 + $0x8] sm:$0xff]   ;;  %v2102_v44 = vld [vmem:[#allocation6 + $0x40] sm:$0xff]   ;;  %v2374_v2 = vld [vmem:[#allocation6 + $0xb8] sm:$0xff]  }
  0x3e   :  { %1822 = vmatpush3.bf16.msra.mxu0 %v2092_v4  ;;  %102 = vst [vmem:[#allocation2 + $0x18] sm:$0x1] %v101_v31  ;;  %v139_v35 = vshrl.u32 %v1683_v27, 16  ;;  %v142_v36 = vshll.u32 %v1683_v27, 16  ;;  %v124_v38 = vrot.slane %v122_v29, 7  ;;  %v2103_v53 = vld [vmem:[#allocation6] sm:$0xff]   ;;  %vm2398_vm14 = vmor %vm487_vm11, %vm488_vm12 }
  0x3f   :  { %1842 = vmatpush3.bf16.msra.mxu1 %v2093_v5  ;;  %1823 = vmatprep.subr.bf16.mxu0 %v2094_v6  ;;  %v147_v39 = vshrl.u32 %v1684_v32, 16  ;;  %v150_v40 = vshll.u32 %v1684_v32, 16  ;;  %v132_v42 = vrot.slane %v130_v33, 7 }
  0x40   :  { %1843 = vmatprep.subr.bf16.mxu1 %v2095_v7  ;;  %v141_v43 = vrot.slane %v139_v35, 7  ;;  %v127_v45 = vor.u32 %v125_v30, %v124_v38  ;;  %v128_v46 = vrot.slane %v124_v38, 4  ;;  %v2134_v30 = vld [vmem:[#allocation8 + $0xa8] sm:$0xff]  }
  0x41   :  { %v149_v48 = vrot.slane %v147_v39, 7  ;;  %v135_v49 = vor.u32 %v133_v34, %v132_v42  ;;  %v137_v50 = vrot.slane %v132_v42, 4  ;;  %v163_v54 = vld [vmem:[#allocation2] sm:$0xf] }
  0x42   :  { %1824 = vmatpush3.bf16.msra.mxu0 %v2094_v6  ;;  %v144_v51 = vor.u32 %v142_v36, %v141_v43  ;;  %v145_v52 = vrot.slane %v141_v43, 4  ;;  %v167_v55 = vld [vmem:[#allocation2 + $0x8] sm:$0x1]  ;;  %v164_v59 = vsel %vm2358_vm8, %v127_v45, %v163_v54  ;;  %v2107_v54 = vld [vmem:[#allocation6 + $0xb0] sm:$0xff]  }
  0x43   :  { %1844 = vmatpush3.bf16.msra.mxu1 %v2095_v7  ;;  %1825 = vmatprep.subr.bf16.mxu0 %v2096_v10  ;;  %v152_v56 = vor.u32 %v150_v40, %v149_v48  ;;  %v154_v57 = vrot.slane %v149_v48, 4  ;;  %v136_v58 = vsel %vm2352_vm7, %v128_v46, %v135_v49  ;;  %v168_v60 = vsel %vm2333_vm3, %v137_v50, %v167_v55  ;;  %v170_v61 = vld [vmem:[#allocation2 + $0x10] sm:$0xf] }
  0x44   :  { %1845 = vmatprep.subr.bf16.mxu1 %v2097_v11  ;;  %165 = vst [vmem:[#allocation2] sm:$0xf] %v164_v59  ;;  %166 = vst [vmem:[#allocation2 + $0x4] sm:$0xf] %v136_v58  ;;  %v171_v63 = vsel %vm2358_vm8, %v144_v51, %v170_v61  ;;  %v2108_v59 = vld [vmem:[#allocation6 + $0xa8] sm:$0xff]   ;;  %v2110_v61 = vld [vmem:[#allocation6 + $0x98] sm:$0xff]  }
  0x45   :  { %169 = vst [vmem:[#allocation2 + $0x8] sm:$0x1] %v168_v60  ;;  %v153_v62 = vsel %vm2352_vm7, %v145_v52, %v152_v56  ;;  %v174_v0 = vld [vmem:[#allocation2 + $0x18] sm:$0x1]  ;;  %172 = vst [vmem:[#allocation2 + $0x10] sm:$0xf] %v171_v63 }
  0x46   :  { %1826 = vmatpush3.bf16.msra.mxu0 %v2096_v10  ;;  %173 = vst [vmem:[#allocation2 + $0x14] sm:$0xf] %v153_v62  ;;  %v175_v1 = vsel %vm2333_vm3, %v154_v57, %v174_v0  ;;  %v2109_v60 = vld [vmem:[#allocation6 + $0xa0] sm:$0xff]   ;;  %v2111_v62 = vld [vmem:[#allocation6 + $0x90] sm:$0xff]   ;;  %v2112_v0 = vld [vmem:[#allocation6 + $0x88] sm:$0xff]  }
  0x47   :  { %1846 = vmatpush3.bf16.msra.mxu1 %v2097_v11  ;;  %1827 = vmatprep.subr.bf16.mxu0 %v2098_v12  ;;  %176 = vst [vmem:[#allocation2 + $0x18] sm:$0x1] %v175_v1 }
  0x48   :  { %1847 = vmatprep.subr.bf16.mxu1 %v2099_v13 }
  0x4a   :  { %1828 = vmatpush3.bf16.msra.mxu0 %v2098_v12 }
  0x4b   :  { %1848 = vmatpush3.bf16.msra.mxu1 %v2099_v13  ;;  %1829 = vmatprep.subr.bf16.mxu0 %v2100_v28  ;;  %v2377_v3 = vld [vmem:[#allocation2] sm:$0xf]  ;;  %v178_v4 = vld [vmem:[#allocation2 + $0x4] sm:$0xf] }
  0x4c   :  { %1849 = vmatprep.subr.bf16.mxu1 %v2101_v37  ;;  %v197_v5 = vld [vmem:[#allocation2 + $0x8] sm:$0x1]  ;;  %v203_v6 = vshrl.u32 %v2377_v3, 16  ;;  %v206_v7 = vshll.u32 %v2377_v3, 16  ;;  %v212_v9 = vshll.u32 %v178_v4, 16  ;;  %v216_v10 = vshrl.u32 %v178_v4, 16 }
  0x4d   :  { %v179_v11 = vld [vmem:[#allocation2 + $0x10] sm:$0xf]  ;;  %v222_v12 = vshll.u32 %v197_v5, 16  ;;  %v1621_v13 = vcombine.low %v2377_v3, %v178_v4  ;;  %v2382_v14 = vld [vmem:[#allocation2 + $0x14] sm:$0xf]  ;;  %v492_v40 = vrot.slane %v178_v4, 5 }
  0x4e   :  { %1830 = vmatpush3.bf16.msra.mxu0 %v2100_v28  ;;  %v2384_v15 = vld [vmem:[#allocation2 + $0x18] sm:$0x1]  ;;  %v227_v16 = vshrl.u32 %v179_v11, 16  ;;  %v205_v17 = vrot.slane %v203_v6, 4  ;;  %v208_v18 = vrot.slane %v206_v7, 5  ;;  %v214_v19 = vrot.slane %v212_v9, 5 }
  0x4f   :  { %1850 = vmatpush3.bf16.msra.mxu1 %v2101_v37  ;;  %1831 = vmatprep.subr.bf16.mxu0 %v2102_v44  ;;  %v218_v20 = vrot.slane %v216_v10, 4  ;;  %v481_v21 = vld [vmem:[#allocation2] sm:$0xe]  ;;  %v224_v22 = vrot.slane %v222_v12, 5  ;;  %v230_v24 = vshll.u32 %v179_v11, 16  ;;  %v236_v25 = vshll.u32 %v2382_v14, 16 }
  0x50   :  { %1851 = vmatprep.subr.bf16.mxu1 %v2103_v53  ;;  %1853 = vmatprep.mubr.bf16.mxu1 %v1621_v13  ;;  %v229_v23 = vrot.slane %v227_v16, 4  ;;  %v209_v26 = vor.u32 %v208_v18, %v205_v17  ;;  %v240_v28 = vshrl.u32 %v2382_v14, 16  ;;  %v246_v29 = vshll.u32 %v2384_v15, 16  ;;  %v482_v1 = vld [vmem:[#allocation2 + $0x10] sm:$0xe]  ;;  %v2113_v6 = vld [vmem:[#allocation6 + $0x80] sm:$0xff]  }
  0x51   :  { %v219_v27 = vor.u32 %v218_v20, %v214_v19  ;;  %v232_v31 = vrot.slane %v230_v24, 5  ;;  %v238_v32 = vrot.slane %v236_v25, 5  ;;  %v1622_v33 = vcombine.low %v179_v11, %v2382_v14  ;;  %v2421_v11 = vld [vmem:[#allocation9 + $0x78] sm:$0xff]  ;;  %v2424_v13 = vld [vmem:[#allocation9 + $0x70] sm:$0xff]  ;;  %v2458_v18 = vld [vmem:[#allocation9 + $0x48] sm:$0xff] }
  0x52   :  { %1832 = vmatpush3.bf16.msra.mxu0 %v2102_v44  ;;  %v1631_v34 = vrot.slane %v481_v21, 9  ;;  %v210_v35 = vrot.slane %v209_v26, 4  ;;  %v242_v37 = vrot.slane %v240_v28, 4  ;;  %v495_v42 = vrot.slane %v197_v5, 5  ;;  %v2446_v16 = vld [vmem:[#allocation9 + $0x58] sm:$0xff]  ;;  %v2452_v17 = vld [vmem:[#allocation9 + $0x50] sm:$0xff] }
  0x53   :  { %1852 = vmatpush3.bf16.msra.mxu1 %v2103_v53  ;;  %1857 = vmatprep.subr.bf16.mxu0 %v2374_v2  ;;  %v220_v36 = vrot.slane %v219_v27, 4  ;;  %v233_v39 = vor.u32 %v232_v31, %v229_v23  ;;  %v248_v46 = vrot.slane %v246_v29, 5  ;;  %v494_v51 = vrot.slane %v492_v40, 4  ;;  %v2470_v20 = vld [vmem:[#allocation9 + $0x38] sm:$0xff]  ;;  %v2476_v21 = vld [vmem:[#allocation9 + $0x30] sm:$0xff]  ;;  %v2488_v23 = vld [vmem:[#allocation9 + $0x20] sm:$0xff] }
  0x54   :  { %v215_v43 = vsel %vm2391_vm13, %v210_v35, %v214_v19  ;;  %v243_v45 = vor.u32 %v242_v37, %v238_v32  ;;  %v493_v50 = vsel %vm2398_vm14, %v1631_v34, %v492_v40  ;;  %v499_v63 = vrot.slane %v2382_v14, 5  ;;  %v2435_v14 = vld [vmem:[#allocation9 + $0x68] sm:$0xff]  ;;  %v2464_v19 = vld [vmem:[#allocation9 + $0x40] sm:$0xff]  ;;  %v2494_v24 = vld [vmem:[#allocation9 + $0x18] sm:$0xff] }
  0x55   :  { %v225_v44 = vsel %vm2391_vm13, %v220_v36, %v224_v22  ;;  %v234_v49 = vrot.slane %v233_v39, 4  ;;  %v496_v55 = vsel %vm2398_vm14, %v494_v51, %v495_v42  ;;  %v1632_v4 = vrot.slane %v482_v1, 9  ;;  %v2482_v22 = vld [vmem:[#allocation9 + $0x28] sm:$0xff]  ;;  %v2496_v25 = vld [vmem:[#allocation9 + $0x10] sm:$0xff]  ;;  %v2509_v27 = vld [vmem:[#allocation9] sm:$0xff] }
  0x56   :  { %1854 = vmatmul.mubr.bf16.vlgmr.msra.gmra.mxu1 %v1622_v33  ;;  %v1611_v48 = vcombine.low %v215_v43, %v225_v44  ;;  %v244_v52 = vrot.slane %v243_v45, 4  ;;  %v1633_v57 = vcombine.low %v493_v50, %v496_v55  ;;  %v502_v5 = vrot.slane %v2384_v15, 5  ;;  %v2440_v15 = vld [vmem:[#allocation9 + $0x60] sm:$0xff]  ;;  %v2503_v26 = vld [vmem:[#allocation9 + $0x8] sm:$0xff] }
  0x57   :  { %v239_v53 = vsel %vm2391_vm13, %v234_v49, %v238_v32  ;;  %v500_v7 = vsel %vm2398_vm14, %v1632_v4, %v499_v63  ;;  %v2260_v12 = vmov 0.0  }
  0x58   :  { %1833 = vmatprep.mubr.bf16.mxu0 %v1611_v48  ;;  %v249_v56 = vsel %vm2391_vm13, %v244_v52, %v248_v46  ;;  %1877 = vmatprep.subr.mxu1 %v2260_v12 }
  0x59   :  { %v1612_v58 = vcombine.low %v239_v53, %v249_v56  ;;  %1878 = vmatpush3.msra.mxu1 %v2421_v11  ;;  %1909 = vmatprep.mubr.msk.f32.mxu1 %vm2261_vm15, %v2260_v12 }
  0x5a   :  { %1879 = vmatprep.subr.mxu1 %v2260_v12 }
  0x5b   :  { %1834 = vmatmul.mubr.bf16.vlgmr.msra.gmra.mxu0 %v1612_v58  ;;  %1880 = vmatpush3.msra.mxu1 %v2424_v13 }
  0x5c   :  { %1858 = vmatpush3.bf16.msra.mxu0 %v2374_v2  ;;  %1873 = vmatprep.mubr.bf16.mxu0 %v1633_v57  ;;  %v501_v2 = vrot.slane %v499_v63, 4 }
  0x5d   :  { %1859 = vmatprep.subr.bf16.mxu0 %v2107_v54  ;;  %1881 = vmatprep.subr.mxu1 %v2260_v12 }
  0x5e   :  { %v503_v9 = vsel %vm2398_vm14, %v501_v2, %v502_v5  ;;  %1882 = vmatpush3.msra.mxu1 %v2435_v14 }
  0x5f   :  { %v1634_v10 = vcombine.low %v500_v7, %v503_v9  ;;  %1883 = vmatprep.subr.mxu1 %v2260_v12 }
  0x60   :  { %1860 = vmatpush3.bf16.msra.mxu0 %v2107_v54  ;;  %1884 = vmatpush3.msra.mxu1 %v2440_v15 }
  0x61   :  { %1861 = vmatprep.subr.bf16.mxu0 %v2108_v59  ;;  %1885 = vmatprep.subr.mxu1 %v2260_v12 }
  0x62   :  { %1886 = vmatpush3.msra.mxu1 %v2446_v16 }
  0x63   :  { %1887 = vmatprep.subr.mxu1 %v2260_v12 }
  0x64   :  { %1862 = vmatpush3.bf16.msra.mxu0 %v2108_v59  ;;  %1888 = vmatpush3.msra.mxu1 %v2452_v17 }
  0x65   :  { %1863 = vmatprep.subr.bf16.mxu0 %v2109_v60  ;;  %1889 = vmatprep.subr.mxu1 %v2260_v12 }
  0x66   :  { %1890 = vmatpush3.msra.mxu1 %v2458_v18 }
  0x67   :  { %1891 = vmatprep.subr.mxu1 %v2260_v12 }
  0x68   :  { %1864 = vmatpush3.bf16.msra.mxu0 %v2109_v60  ;;  %1892 = vmatpush3.msra.mxu1 %v2464_v19 }
  0x69   :  { %1865 = vmatprep.subr.bf16.mxu0 %v2110_v61  ;;  %1893 = vmatprep.subr.mxu1 %v2260_v12 }
  0x6a   :  { %1894 = vmatpush3.msra.mxu1 %v2470_v20 }
  0x6b   :  { %1895 = vmatprep.subr.mxu1 %v2260_v12 }
  0x6c   :  { %1866 = vmatpush3.bf16.msra.mxu0 %v2110_v61  ;;  %1896 = vmatpush3.msra.mxu1 %v2476_v21  ;;  %v728_v61 = vlaneseq }
  0x6d   :  { %1867 = vmatprep.subr.bf16.mxu0 %v2111_v62  ;;  %1897 = vmatprep.subr.mxu1 %v2260_v12 }
  0x6e   :  { %1898 = vmatpush3.msra.mxu1 %v2482_v22 }
  0x6f   :  { %1899 = vmatprep.subr.mxu1 %v2260_v12 }
  0x70   :  { %1868 = vmatpush3.bf16.msra.mxu0 %v2111_v62  ;;  %1900 = vmatpush3.msra.mxu1 %v2488_v23  ;;  %v729_v62 = vshrl.u32 %v728_v61, 7 }
  0x71   :  { %1869 = vmatprep.subr.bf16.mxu0 %v2112_v0  ;;  %1901 = vmatprep.subr.mxu1 %v2260_v12 }
  0x72   :  { %1902 = vmatpush3.msra.mxu1 %v2494_v24  ;;  %v2521_v63 = vsub.s32 0, %v729_v62 }
  0x73   :  { %1903 = vmatprep.subr.mxu1 %v2260_v12 }
  0x74   :  { %1870 = vmatpush3.bf16.msra.mxu0 %v2112_v0  ;;  %1904 = vmatpush3.msra.mxu1 %v2496_v25 }
  0x75   :  { %1871 = vmatprep.subr.bf16.mxu0 %v2113_v6  ;;  %1905 = vmatprep.subr.mxu1 %v2260_v12 }
  0x76   :  { %1906 = vmatpush3.msra.mxu1 %v2503_v26 }
  0x77   :  { %1907 = vmatprep.subr.mxu1 %v2260_v12 }
  0x78   :  { %1872 = vmatpush3.bf16.msra.mxu0 %v2113_v6  ;;  %1908 = vmatpush3.msra.mxu1 %v2509_v27 }
  0x79   :  { %1912 = vmatprep.subr.mxu0 %v2260_v12 }
  0x7b   :  { %1874 = vmatmul.mubr.bf16.vlgmr.msra.gmra.mxu0 %v1634_v10 }
  0x7c   :  { %1913 = vmatpush3.msra.mxu0 %v2421_v11  ;;  %1944 = vmatprep.mubr.msk.f32.mxu0 %vm2261_vm15, %v2260_v12 }
  0x7d   :  { %1914 = vmatprep.subr.mxu0 %v2260_v12 }
  0x7e   :  { %1915 = vmatpush3.msra.mxu0 %v2424_v13 }
  0x7f   :  { %1916 = vmatprep.subr.mxu0 %v2260_v12 }
  0x80   :  { %1917 = vmatpush3.msra.mxu0 %v2435_v14 }
  0x81   :  { %1918 = vmatprep.subr.mxu0 %v2260_v12 }
  0x82   :  { %1919 = vmatpush3.msra.mxu0 %v2440_v15 }
  0x83   :  { %1920 = vmatprep.subr.mxu0 %v2260_v12 }
  0x84   :  { %1921 = vmatpush3.msra.mxu0 %v2446_v16 }
  0x85   :  { %1922 = vmatprep.subr.mxu0 %v2260_v12 }
  0x86   :  { %1923 = vmatpush3.msra.mxu0 %v2452_v17 }
  0x87   :  { %1924 = vmatprep.subr.mxu0 %v2260_v12 }
  0x88   :  { %1925 = vmatpush3.msra.mxu0 %v2458_v18 }
  0x89   :  { %1926 = vmatprep.subr.mxu0 %v2260_v12 }
  0x8a   :  { %1927 = vmatpush3.msra.mxu0 %v2464_v19 }
  0x8b   :  { %1928 = vmatprep.subr.mxu0 %v2260_v12 }
  0x8c   :  { %1929 = vmatpush3.msra.mxu0 %v2470_v20 }
  0x8d   :  { %1930 = vmatprep.subr.mxu0 %v2260_v12 }
  0x8e   :  { %1931 = vmatpush3.msra.mxu0 %v2476_v21 }
  0x8f   :  { %1932 = vmatprep.subr.mxu0 %v2260_v12 }
  0x90   :  { %1933 = vmatpush3.msra.mxu0 %v2482_v22 }
  0x91   :  { %1934 = vmatprep.subr.mxu0 %v2260_v12 }
  0x92   :  { %1935 = vmatpush3.msra.mxu0 %v2488_v23 }
  0x93   :  { %1936 = vmatprep.subr.mxu0 %v2260_v12 }
  0x94   :  { %1937 = vmatpush3.msra.mxu0 %v2494_v24 }
  0x95   :  { %1938 = vmatprep.subr.mxu0 %v2260_v12 }
  0x96   :  { %1939 = vmatpush3.msra.mxu0 %v2496_v25 }
  0x97   :  { %1940 = vmatprep.subr.mxu0 %v2260_v12 }
  0x98   :  { %1941 = vmatpush3.msra.mxu0 %v2503_v26 }
  0x99   :  { %1942 = vmatprep.subr.mxu0 %v2260_v12 }
  0x9a   :  { %1943 = vmatpush3.msra.mxu0 %v2509_v27 }
 0x116   :  { %v1855_v29 = vpop.f32.mrf.mxu1 }
 0x118   :  { %v466_v32 = vpop.f32.mrf.mxu1 }
 0x11a   :  { %v1856_v34 = vpop.f32.mrf.mxu1 }
 0x11b   :  { %v1835_v28 = vpop.f32.mrf.mxu0 }
 0x11c   :  { %v469_v37 = vpop.f32.mrf.mxu1  ;;  %v475_v45 = vadd.f32 %v1855_v29, %v1835_v28 }
 0x11d   :  { %v357_v31 = vpop.f32.mrf.mxu0 }
 0x11e   :  { %v467_v42 = vadd.f32 %v466_v32, %v357_v31 }
 0x11f   :  { %v1836_v33 = vpop.f32.mrf.mxu0 }
 0x120   :  { %v478_v49 = vadd.f32 %v1856_v34, %v1836_v33 }
 0x121   :  { %v360_v35 = vpop.f32.mrf.mxu0 }
 0x122   :  { %v470_v43 = vadd.f32 %v469_v37, %v360_v35 }
 0x13b   :  { %v1875_v36 = vpop.f32.mrf.mxu0 }
 0x13c   :  { %v628_v50 = vadd.f32 %v1875_v36, %v475_v45  ;;  %v2116_v45 = vld [vmem:[#allocation8 + $0x78] sm:$0xff]  }
 0x13d   :  { %v611_v39 = vpop.f32.mrf.mxu0  ;;  %1947 = vmatprep.subr.bf16.mxu1 %v2116_v45 }
 0x13e   :  { %v626_v46 = vadd.f32 %v611_v39, %v467_v42 }
 0x13f   :  { %v1876_v40 = vpop.f32.mrf.mxu0 }
 0x140   :  { %v629_v52 = vadd.f32 %v1876_v40, %v478_v49  ;;  %v2119_v49 = vld [vmem:[#allocation8 + $0x20] sm:$0xff]  }
 0x141   :  { %v614_v44 = vpop.f32.mrf.mxu0 }
 0x142   :  { %v627_v48 = vadd.f32 %v614_v44, %v470_v43  ;;  %v2114_v43 = vld [vmem:[#allocation8 + $0x38] sm:$0xff]   ;;  %v2115_v44 = vld [vmem:[#allocation8 + $0x30] sm:$0xff]  }
 0x143   :  { %1967 = vmatprep.subr.bf16.mxu0 %v2114_v43 }
 0x144   :  { %v632_v51 = vadd.f32 %v627_v48, %v626_v46 }
 0x146   :  { %v633_v53 = vadd.f32 %v632_v51, %v628_v50  ;;  %v2121_v51 = vld [vmem:[#allocation8 + $0x18] sm:$0xff]  }
 0x148   :  { %v634_v54 = vadd.f32 %v633_v53, %v629_v52  ;;  %v2123_v53 = vld [vmem:[#allocation8 + $0x10] sm:$0xff]  }
 0x14a   :  { %v635_v55 = vrot.slane %v634_v54, 4 }
 0x14c   :  { %v636_v56 = vadd.f32 %v635_v55, %v634_v54  ;;  %v2124_v54 = vld [vmem:[#allocation8 + $0x58] sm:$0xff]   ;;  %v2125_v55 = vld [vmem:[#allocation8 + $0x8] sm:$0xff]  }
 0x14e   :  { %v637_v57 = vrot.slane %v636_v56, 2 }
 0x150   :  { %v638_v58 = vadd.f32 %v637_v57, %v636_v56  ;;  %v2126_v56 = vld [vmem:[#allocation8 + $0x50] sm:$0xff]   ;;  %v2127_v57 = vld [vmem:[#allocation8] sm:$0xff]  }
 0x152   :  { %v639_v59 = vrot.slane %v638_v58, 1 }
 0x154   :  { %v640_v60 = vadd.f32 %v639_v59, %v638_v58  ;;  %v2129_v58 = vld [vmem:[#allocation8 + $0x48] sm:$0xff]   ;;  %v2131_v59 = vld [vmem:[#allocation8 + $0x40] sm:$0xff]  }
 0x156   :  { %1910 = vmatmul.mubr.f32.vlgmr.msra.gmra.mxu1 %v640_v60  ;;  %v2541_v60 = vld [vmem:[#allocation8 + $0xb8] sm:$0xff]  }
 0x157   :  { %1948 = vmatpush3.bf16.msra.mxu1 %v2116_v45 }
 0x216   :  { %v723_v0 = vpop.f32.mrf.mxu1 }
 0x217   :  { %v727_v1 = vmul.f32 0.001953125, %v723_v0 }
 0x218   :  { %v1911_v4 = vpop.f32.mrf.mxu1 }
 0x219   :  { %v731_v2 = vrot.slane %v727_v1, %v2521_v63  ;;  %v630_v4 = vld [vmem:[%s2680_s4] sm:$0x1] }
 0x21b   :  { %v2524_v5 = vsub.f32 %v626_v46, %v731_v2  ;;  %v2526_v6 = vsub.f32 %v627_v48, %v731_v2  ;;  %v2528_v7 = vsub.f32 %v628_v50, %v731_v2  ;;  %v2530_v9 = vsub.f32 %v629_v52, %v731_v2  ;;  %v2117_v46 = vld [vmem:[#allocation8 + $0x28] sm:$0xff]   ;;  %v2118_v48 = vld [vmem:[#allocation8 + $0x70] sm:$0xff]   ;;  %v2122_v52 = vld [vmem:[#allocation8 + $0x60] sm:$0xff]  }
 0x21c   :  { %1949 = vmatprep.subr.bf16.mxu1 %v2118_v48  ;;  %v2120_v50 = vld [vmem:[#allocation8 + $0x68] sm:$0xff]  }
 0x21d   :  { %v736_v10 = vmul.f32 %v2524_v5, %v2524_v5  ;;  %v737_v28 = vmul.f32 %v2526_v6, %v2526_v6  ;;  %v738_v29 = vmul.f32 %v2528_v7, %v2528_v7  ;;  %v739_v32 = vmul.f32 %v2530_v9, %v2530_v9  ;;  %1950 = vmatpush3.bf16.msra.mxu1 %v2118_v48 }
 0x21e   :  { %1951 = vmatprep.subr.bf16.mxu1 %v2120_v50 }
 0x21f   :  { %v740_v31 = vadd.f32 %v737_v28, %v736_v10 }
 0x221   :  { %v741_v33 = vadd.f32 %v740_v31, %v738_v29  ;;  %1952 = vmatpush3.bf16.msra.mxu1 %v2120_v50  ;;  %v1643_v29 = vld [vmem:[%s2681_s5] ss:$0 sm:$0xff] }
 0x222   :  { %1953 = vmatprep.subr.bf16.mxu1 %v2122_v52 }
 0x223   :  { %v742_v34 = vadd.f32 %v741_v33, %v739_v32 }
 0x225   :  { %v743_v35 = vrot.slane %v742_v34, 4  ;;  %1954 = vmatpush3.bf16.msra.mxu1 %v2122_v52 }
 0x226   :  { %1955 = vmatprep.subr.bf16.mxu1 %v2124_v54 }
 0x227   :  { %v744_v36 = vadd.f32 %v743_v35, %v742_v34 }
 0x229   :  { %v745_v37 = vrot.slane %v744_v36, 2  ;;  %1956 = vmatpush3.bf16.msra.mxu1 %v2124_v54 }
 0x22a   :  { %1957 = vmatprep.subr.bf16.mxu1 %v2126_v56 }
 0x22b   :  { %v746_v39 = vadd.f32 %v745_v37, %v744_v36 }
 0x22d   :  { %v747_v40 = vrot.slane %v746_v39, 1  ;;  %1958 = vmatpush3.bf16.msra.mxu1 %v2126_v56 }
 0x22e   :  { %1959 = vmatprep.subr.bf16.mxu1 %v2129_v58 }
 0x22f   :  { %v748_v42 = vadd.f32 %v747_v40, %v746_v39 }
 0x231   :  { %1945 = vmatmul.mubr.f32.vlgmr.msra.gmra.mxu0 %v748_v42  ;;  %1960 = vmatpush3.bf16.msra.mxu1 %v2129_v58  ;;  %v902_v58 = vld [vmem:[#allocation2 + $0x8] sm:$0x1] }
 0x232   :  { %1968 = vmatpush3.bf16.msra.mxu0 %v2114_v43  ;;  %1961 = vmatprep.subr.bf16.mxu1 %v2131_v59 }
 0x233   :  { %1969 = vmatprep.subr.bf16.mxu0 %v2115_v44 }
 0x235   :  { %1962 = vmatpush3.bf16.msra.mxu1 %v2131_v59 }
 0x236   :  { %1970 = vmatpush3.bf16.msra.mxu0 %v2115_v44  ;;  %1987 = vmatprep.subr.bf16.mxu1 %v2541_v60 }
 0x237   :  { %1971 = vmatprep.subr.bf16.mxu0 %v2117_v46 }
 0x23a   :  { %1972 = vmatpush3.bf16.msra.mxu0 %v2117_v46 }
 0x23b   :  { %1973 = vmatprep.subr.bf16.mxu0 %v2119_v49 }
 0x23e   :  { %1974 = vmatpush3.bf16.msra.mxu0 %v2119_v49 }
 0x23f   :  { %1975 = vmatprep.subr.bf16.mxu0 %v2121_v51 }
 0x242   :  { %1976 = vmatpush3.bf16.msra.mxu0 %v2121_v51 }
 0x243   :  { %1977 = vmatprep.subr.bf16.mxu0 %v2123_v53 }
 0x246   :  { %1978 = vmatpush3.bf16.msra.mxu0 %v2123_v53 }
 0x247   :  { %1979 = vmatprep.subr.bf16.mxu0 %v2125_v55 }
 0x24a   :  { %1980 = vmatpush3.bf16.msra.mxu0 %v2125_v55 }
 0x24b   :  { %1981 = vmatprep.subr.bf16.mxu0 %v2127_v57 }
 0x24e   :  { %1982 = vmatpush3.bf16.msra.mxu0 %v2127_v57 }
 0x24f   :  { %2007 = vmatprep.subr.mxu0 %v2260_v12 }
 0x2f1   :  { %v815_v61 = vpop.f32.mrf.mxu0 }
 0x2f2   :  { %v819_v62 = vmul.f32 0.001953125, %v815_v61 }
 0x2f3   :  { %v1946_v0 = vpop.f32.mrf.mxu0 }
 0x2f4   :  { %v820_v1 = vadd.f32 1e-05, %v819_v62 }
 0x2f6   :  { %2140 = vrsqrt.f32 %v820_v1  ;;  %v905_v1 = vld [vmem:[#allocation2 + $0x10] sm:$0xf] }
 0x303   :  { %v2141_v2 = vpop.eup %2140 }
 0x304   :  { %v822_v10 = vmul.f32 %v2141_v2, %v630_v4  ;;  %v909_v4 = vld [vmem:[#allocation2 + $0x18] sm:$0x1] }
 0x306   :  { %v827_v28 = vrot.slane %v822_v10, %v2521_v63 }
 0x308   :  { %v829_v31 = vmul.f32 %v827_v28, %v2524_v5  ;;  %v830_v32 = vmul.f32 %v827_v28, %v2526_v6  ;;  %v831_v33 = vmul.f32 %v827_v28, %v2528_v7  ;;  %v832_v34 = vmul.f32 %v827_v28, %v2530_v9 }
 0x30a   :  { %v839_v35 = vadd.f32 %v1643_v29, %v829_v31  ;;  %v840_v36 = vadd.f32 %v1643_v29, %v830_v32  ;;  %v841_v37 = vadd.f32 %v1643_v29, %v831_v33  ;;  %v842_v39 = vadd.f32 %v1643_v29, %v832_v34 }
 0x30c   :  { %v843_v40 = vmax.f32 %v839_v35, 0.0  ;;  %v844_v42 = vmax.f32 %v840_v36, 0.0  ;;  %v845_v43 = vmax.f32 %v841_v37, 0.0  ;;  %v846_v44 = vmax.f32 %v842_v39, 0.0 }
 0x30e   :  { %v1685_v45 = vpack.c.bf16 %v843_v40, %v843_v40  ;;  %v1686_v46 = vpack.c.bf16 %v844_v42, %v844_v42  ;;  %v1687_v48 = vpack.c.bf16 %v845_v43, %v845_v43  ;;  %v1688_v49 = vpack.c.bf16 %v846_v44, %v846_v44 }
 0x310   :  { %v860_v50 = vshrl.u32 %v1685_v45, 16  ;;  %v868_v5 = vshrl.u32 %v1686_v46, 16  ;;  %v877_v51 = vshrl.u32 %v1687_v48, 16  ;;  %v885_v6 = vshrl.u32 %v1688_v49, 16 }
 0x311   :  { %v863_v7 = vshll.u32 %v1685_v45, 16  ;;  %v871_v9 = vshll.u32 %v1686_v46, 16  ;;  %v880_v55 = vshll.u32 %v1687_v48, 16  ;;  %v888_v57 = vshll.u32 %v1688_v49, 16 }
 0x312   :  { %v862_v52 = vrot.slane %v860_v50, 7  ;;  %v870_v53 = vrot.slane %v868_v5, 7  ;;  %v879_v54 = vrot.slane %v877_v51, 7  ;;  %v887_v56 = vrot.slane %v885_v6, 7 }
 0x314   :  { %v865_v59 = vor.u32 %v863_v7, %v862_v52  ;;  %v866_v61 = vrot.slane %v862_v52, 4  ;;  %v873_v62 = vor.u32 %v871_v9, %v870_v53  ;;  %v875_v0 = vrot.slane %v870_v53, 4 }
 0x315   :  { %v882_v2 = vor.u32 %v880_v55, %v879_v54  ;;  %v883_v10 = vrot.slane %v879_v54, 4  ;;  %v890_v28 = vor.u32 %v888_v57, %v887_v56  ;;  %v892_v29 = vrot.slane %v887_v56, 4 }
 0x316   :  { %v874_v31 = vsel %vm2352_vm7, %v866_v61, %v873_v62  ;;  %v899_v32 = vsel %vm2358_vm8, %v865_v59, %v2377_v3  ;;  %v903_v33 = vsel %vm2333_vm3, %v875_v0, %v902_v58 }
 0x317   :  { %v891_v34 = vsel %vm2352_vm7, %v883_v10, %v890_v28  ;;  %v906_v35 = vsel %vm2358_vm8, %v882_v2, %v905_v1  ;;  %v910_v36 = vsel %vm2333_vm3, %v892_v29, %v909_v4  ;;  %900 = vst [vmem:[#allocation2] sm:$0xf] %v899_v32  ;;  %901 = vst [vmem:[#allocation2 + $0x4] sm:$0xf] %v874_v31 }
 0x318   :  { %904 = vst [vmem:[#allocation2 + $0x8] sm:$0x1] %v903_v33  ;;  %908 = vst [vmem:[#allocation2 + $0x14] sm:$0xf] %v891_v34 }
 0x319   :  { %907 = vst [vmem:[#allocation2 + $0x10] sm:$0xf] %v906_v35  ;;  %911 = vst [vmem:[#allocation2 + $0x18] sm:$0x1] %v910_v36 }
 0x31e   :  { %v912_v37 = vld [vmem:[#allocation2] sm:$0xf]  ;;  %v913_v3 = vld [vmem:[#allocation2 + $0x4] sm:$0xf] }
 0x31f   :  { %v932_v39 = vld [vmem:[#allocation2 + $0x8] sm:$0x1]  ;;  %v935_v40 = vshrl.u32 %v912_v37, 16  ;;  %v938_v42 = vshll.u32 %v912_v37, 16  ;;  %v948_v43 = vshrl.u32 %v913_v3, 16  ;;  %v1658_v41 = vcombine.low %v912_v37, %v913_v3 }
 0x320   :  { %v914_v44 = vld [vmem:[#allocation2 + $0x10] sm:$0xf]  ;;  %v2568_v45 = vld [vmem:[#allocation2 + $0x14] sm:$0xf]  ;;  %v944_v8 = vshll.u32 %v913_v3, 16  ;;  %v954_v48 = vshll.u32 %v932_v39, 16 }
 0x321   :  { %v959_v47 = vshrl.u32 %v914_v44, 16  ;;  %v962_v46 = vshll.u32 %v914_v44, 16  ;;  %v937_v49 = vrot.slane %v935_v40, 4  ;;  %v940_v50 = vrot.slane %v938_v42, 5  ;;  %1983 = vmatprep.mubr.bf16.mxu0 %v1658_v41  ;;  %v2572_v9 = vld [vmem:[#allocation2 + $0x18] sm:$0x1] }
 0x322   :  { %v972_v5 = vshrl.u32 %v2568_v45, 16  ;;  %v1659_v51 = vcombine.low %v914_v44, %v2568_v45  ;;  %v946_v7 = vrot.slane %v944_v8, 5  ;;  %v950_v53 = vrot.slane %v948_v43, 4  ;;  %v1213_v0 = vld [vmem:[#allocation2] sm:$0xe]  ;;  %v2133_v41 = vld [vmem:[#allocation8 + $0xb0] sm:$0xff]  }
 0x323   :  { %v961_v6 = vrot.slane %v959_v47, 4  ;;  %v964_v52 = vrot.slane %v962_v46, 5  ;;  %v941_v54 = vor.u32 %v940_v50, %v937_v49  ;;  %v968_v55 = vshll.u32 %v2568_v45, 16  ;;  %v2135_v47 = vld [vmem:[#allocation8 + $0xa0] sm:$0xff]   ;;  %v2137_v46 = vld [vmem:[#allocation8 + $0x90] sm:$0xff]   ;;  %v2138_v8 = vld [vmem:[#allocation8 + $0x88] sm:$0xff]  }
 0x324   :  { %1984 = vmatmul.mubr.bf16.vlgmr.msra.gmra.mxu0 %v1659_v51  ;;  %v974_v56 = vrot.slane %v972_v5, 4  ;;  %v951_v57 = vor.u32 %v950_v53, %v946_v7  ;;  %v978_v62 = vshll.u32 %v2572_v9, 16  ;;  %v1221_v1 = vrot.slane %v913_v3, 5  ;;  %v2139_v49 = vld [vmem:[#allocation8 + $0x80] sm:$0xff]   ;;  %v1214_v50 = vld [vmem:[#allocation2 + $0x10] sm:$0xe] }
 0x325   :  { %v965_v58 = vor.u32 %v964_v52, %v961_v6  ;;  %2008 = vmatpush3.msra.mxu0 %v2421_v11  ;;  %2039 = vmatprep.mubr.msk.f32.mxu0 %vm2261_vm15, %v2260_v12  ;;  %v942_v59 = vrot.slane %v941_v54, 4  ;;  %v970_v61 = vrot.slane %v968_v55, 5  ;;  %v956_v2 = vrot.slane %v954_v48, 5 }
 0x326   :  { %2009 = vmatprep.subr.mxu0 %v2260_v12  ;;  %v952_v4 = vrot.slane %v951_v57, 4  ;;  %v1223_v31 = vrot.slane %v1221_v1, 4  ;;  %v1668_v33 = vrot.slane %v1213_v0, 9  ;;  %v1224_v34 = vrot.slane %v932_v39, 5 }
 0x327   :  { %v966_v10 = vrot.slane %v965_v58, 4  ;;  %2010 = vmatpush3.msra.mxu0 %v2424_v13  ;;  %v947_v28 = vsel %vm2391_vm13, %v942_v59, %v946_v7  ;;  %v975_v29 = vor.u32 %v974_v56, %v970_v61  ;;  %v980_v3 = vrot.slane %v978_v62, 5 }
 0x328   :  { %2011 = vmatprep.subr.mxu0 %v2260_v12  ;;  %v957_v32 = vsel %vm2391_vm13, %v952_v4, %v956_v2  ;;  %v1225_v40 = vsel %vm2398_vm14, %v1223_v31, %v1224_v34  ;;  %v1222_v43 = vsel %vm2398_vm14, %v1668_v33, %v1221_v1  ;;  %v1228_v48 = vrot.slane %v2568_v45, 5 }
 0x329   :  { %2012 = vmatpush3.msra.mxu0 %v2435_v14  ;;  %v1648_v35 = vcombine.low %v947_v28, %v957_v32  ;;  %v971_v36 = vsel %vm2391_vm13, %v966_v10, %v970_v61  ;;  %v976_v37 = vrot.slane %v975_v29, 4  ;;  %v1670_v44 = vcombine.low %v1222_v43, %v1225_v40 }
 0x32a   :  { %2013 = vmatprep.subr.mxu0 %v2260_v12  ;;  %v1230_v5 = vrot.slane %v1228_v48, 4  ;;  %v1669_v51 = vrot.slane %v1214_v50, 9  ;;  %v1231_v6 = vrot.slane %v2572_v9, 5 }
 0x32b   :  { %2014 = vmatpush3.msra.mxu0 %v2440_v15  ;;  %1963 = vmatprep.mubr.bf16.mxu1 %v1648_v35  ;;  %v981_v42 = vsel %vm2391_vm13, %v976_v37, %v980_v3 }
 0x32c   :  { %2015 = vmatprep.subr.mxu0 %v2260_v12  ;;  %v1649_v39 = vcombine.low %v971_v36, %v981_v42  ;;  %v1232_v52 = vsel %vm2398_vm14, %v1230_v5, %v1231_v6  ;;  %v1229_v45 = vsel %vm2398_vm14, %v1669_v51, %v1228_v48  ;;  %v1359_v48 = vld [vmem:[%s2682_s6] sm:$0x1]  ;;  %s2262_s6 = smov [#allocation11]  }
 0x32d   :  { %2016 = vmatpush3.msra.mxu0 %v2446_v16  ;;  %v1671_v7 = vcombine.low %v1229_v45, %v1232_v52  ;;  %v1680_v51 = vld [vmem:[%s2683_s7] ss:$0 sm:$0xff]  ;;  %s1593_s9 = sshll.u32 %s2262_s6, 4  ;;  %s1594_s9 = int_to_ptr.vmem [resolvable:$true] %s1593_s9 }
 0x32e   :  { %2017 = vmatprep.subr.mxu0 %v2260_v12  ;;  %1964 = vmatmul.mubr.bf16.vlgmr.msra.gmra.mxu1 %v1649_v39  ;;  %s2224_s7 = scalar_lea.vmem %s1594_s9, 512  ;;  %p2229_p7 = scmp.lt.s32.totalorder %s1594_s9, %s1594_s9 }
 0x32f   :  { %2018 = vmatpush3.msra.mxu0 %v2452_v17  ;;  %1988 = vmatpush3.bf16.msra.mxu1 %v2541_v60  ;;  %v2136_v60 = vld [vmem:[#allocation8 + $0x98] sm:$0xff]   ;;  %p2225_p6 = scmp.ne.s32.totalorder %s1594_s9, %s2224_s7  ;;  %p2230_p8 = scmp.lt.s32.totalorder %s2224_s7, %s2224_s7 }
 0x330   :  { %2003 = vmatprep.mubr.bf16.mxu1 %v1670_v44  ;;  %1989 = vmatprep.subr.bf16.mxu1 %v2133_v41 }
 0x331   :  { %2019 = vmatprep.subr.mxu0 %v2260_v12  ;;  %p2231_p9 = por %p2230_p8, %p2229_p7 }
 0x332   :  { %2020 = vmatpush3.msra.mxu0 %v2458_v18 }
 0x333   :  { %2021 = vmatprep.subr.mxu0 %v2260_v12  ;;  %1990 = vmatpush3.bf16.msra.mxu1 %v2133_v41  ;;  %p2232_p10 = pnand %p2231_p9, %p2225_p6 }
 0x334   :  { %2022 = vmatpush3.msra.mxu0 %v2464_v19  ;;  %1991 = vmatprep.subr.bf16.mxu1 %v2134_v30 }
 0x335   :  { %2023 = vmatprep.subr.mxu0 %v2260_v12 }
 0x336   :  { %2024 = vmatpush3.msra.mxu0 %v2470_v20 }
 0x337   :  { %2025 = vmatprep.subr.mxu0 %v2260_v12  ;;  %1992 = vmatpush3.bf16.msra.mxu1 %v2134_v30 }
 0x338   :  { %2026 = vmatpush3.msra.mxu0 %v2476_v21  ;;  %1993 = vmatprep.subr.bf16.mxu1 %v2135_v47 }
 0x339   :  { %2027 = vmatprep.subr.mxu0 %v2260_v12 }
 0x33a   :  { %2028 = vmatpush3.msra.mxu0 %v2482_v22 }
 0x33b   :  { %2029 = vmatprep.subr.mxu0 %v2260_v12  ;;  %1994 = vmatpush3.bf16.msra.mxu1 %v2135_v47 }
 0x33c   :  { %2030 = vmatpush3.msra.mxu0 %v2488_v23  ;;  %1995 = vmatprep.subr.bf16.mxu1 %v2136_v60 }
 0x33d   :  { %2031 = vmatprep.subr.mxu0 %v2260_v12 }
 0x33e   :  { %2032 = vmatpush3.msra.mxu0 %v2494_v24 }
 0x33f   :  { %2033 = vmatprep.subr.mxu0 %v2260_v12  ;;  %1996 = vmatpush3.bf16.msra.mxu1 %v2136_v60 }
 0x340   :  { %2034 = vmatpush3.msra.mxu0 %v2496_v25  ;;  %1997 = vmatprep.subr.bf16.mxu1 %v2137_v46 }
 0x341   :  { %2035 = vmatprep.subr.mxu0 %v2260_v12 }
 0x342   :  { %2036 = vmatpush3.msra.mxu0 %v2503_v26 }
 0x343   :  { %2037 = vmatprep.subr.mxu0 %v2260_v12  ;;  %1998 = vmatpush3.bf16.msra.mxu1 %v2137_v46 }
 0x344   :  { %2038 = vmatpush3.msra.mxu0 %v2509_v27  ;;  %1999 = vmatprep.subr.bf16.mxu1 %v2138_v8 }
 0x347   :  { %2000 = vmatpush3.bf16.msra.mxu1 %v2138_v8 }
 0x348   :  { %2001 = vmatprep.subr.bf16.mxu1 %v2139_v49 }
 0x34b   :  { %2002 = vmatpush3.bf16.msra.mxu1 %v2139_v49 }
 0x34c   :  { %2042 = vmatprep.subr.mxu1 %v2260_v12 }
 0x34e   :  { %2004 = vmatmul.mubr.bf16.vlgmr.msra.gmra.mxu1 %v1671_v7 }
 0x34f   :  { %2043 = vmatpush3.msra.mxu1 %v2421_v11  ;;  %2074 = vmatprep.mubr.msk.f32.mxu1 %vm2261_vm15, %v2260_v12 }
 0x350   :  { %2044 = vmatprep.subr.mxu1 %v2260_v12 }
 0x351   :  { %2045 = vmatpush3.msra.mxu1 %v2424_v13 }
 0x352   :  { %2046 = vmatprep.subr.mxu1 %v2260_v12 }
 0x353   :  { %2047 = vmatpush3.msra.mxu1 %v2435_v14 }
 0x354   :  { %2048 = vmatprep.subr.mxu1 %v2260_v12 }
 0x355   :  { %2049 = vmatpush3.msra.mxu1 %v2440_v15 }
 0x356   :  { %2050 = vmatprep.subr.mxu1 %v2260_v12 }
 0x357   :  { %2051 = vmatpush3.msra.mxu1 %v2446_v16 }
 0x358   :  { %2052 = vmatprep.subr.mxu1 %v2260_v12 }
 0x359   :  { %2053 = vmatpush3.msra.mxu1 %v2452_v17 }
 0x35a   :  { %2054 = vmatprep.subr.mxu1 %v2260_v12 }
 0x35b   :  { %2055 = vmatpush3.msra.mxu1 %v2458_v18 }
 0x35c   :  { %2056 = vmatprep.subr.mxu1 %v2260_v12 }
 0x35d   :  { %2057 = vmatpush3.msra.mxu1 %v2464_v19 }
 0x35e   :  { %2058 = vmatprep.subr.mxu1 %v2260_v12 }
 0x35f   :  { %2059 = vmatpush3.msra.mxu1 %v2470_v20 }
 0x360   :  { %2060 = vmatprep.subr.mxu1 %v2260_v12 }
 0x361   :  { %2061 = vmatpush3.msra.mxu1 %v2476_v21 }
 0x362   :  { %2062 = vmatprep.subr.mxu1 %v2260_v12 }
 0x363   :  { %2063 = vmatpush3.msra.mxu1 %v2482_v22 }
 0x364   :  { %2064 = vmatprep.subr.mxu1 %v2260_v12 }
 0x365   :  { %2065 = vmatpush3.msra.mxu1 %v2488_v23 }
 0x366   :  { %2066 = vmatprep.subr.mxu1 %v2260_v12 }
 0x367   :  { %2067 = vmatpush3.msra.mxu1 %v2494_v24 }
 0x368   :  { %2068 = vmatprep.subr.mxu1 %v2260_v12 }
 0x369   :  { %2069 = vmatpush3.msra.mxu1 %v2496_v25 }
 0x36a   :  { %2070 = vmatprep.subr.mxu1 %v2260_v12 }
 0x36b   :  { %2071 = vmatpush3.msra.mxu1 %v2503_v26 }
 0x36c   :  { %2072 = vmatprep.subr.mxu1 %v2260_v12 }
 0x36d   :  { %2073 = vmatpush3.msra.mxu1 %v2509_v27 }
 0x3e4   :  { %v1985_v13 = vpop.f32.mrf.mxu0 }
 0x3e6   :  { %v1198_v15 = vpop.f32.mrf.mxu0 }
 0x3e8   :  { %v1986_v17 = vpop.f32.mrf.mxu0 }
 0x3ea   :  { %v1201_v20 = vpop.f32.mrf.mxu0 }
 0x3ee   :  { %v1965_v38 = vpop.f32.mrf.mxu1 }
 0x3ef   :  { %v1207_v25 = vadd.f32 %v1985_v13, %v1965_v38  ;;  %v1572_v38 = vld [vmem:[#allocation3] sm:$0xff]  ;;  %v1574_v13 = vld [vmem:[#allocation3 + $0x10] sm:$0xff] }
 0x3f0   :  { %v1089_v11 = vpop.f32.mrf.mxu1 }
 0x3f1   :  { %v1199_v22 = vadd.f32 %v1198_v15, %v1089_v11  ;;  %v1573_v11 = vld [vmem:[#allocation3 + $0x8] sm:$0xff] }
 0x3f2   :  { %v1966_v14 = vpop.f32.mrf.mxu1 }
 0x3f3   :  { %v1210_v12 = vadd.f32 %v1986_v17, %v1966_v14  ;;  %v1575_v14 = vld [vmem:[#allocation3 + $0x18] sm:$0xff] }
 0x3f4   :  { %v1092_v16 = vpop.f32.mrf.mxu1 }
 0x3f5   :  { %v1202_v23 = vadd.f32 %v1201_v20, %v1092_v16 }
 0x40e   :  { %v2005_v18 = vpop.f32.mrf.mxu1 }
 0x40f   :  { %v1357_v9 = vadd.f32 %v2005_v18, %v1207_v25 }
 0x410   :  { %v1340_v19 = vpop.f32.mrf.mxu1 }
 0x411   :  { %v1355_v26 = vadd.f32 %v1340_v19, %v1199_v22 }
 0x412   :  { %v2006_v21 = vpop.f32.mrf.mxu1 }
 0x413   :  { %v1358_v54 = vadd.f32 %v2006_v21, %v1210_v12 }
 0x414   :  { %v1343_v24 = vpop.f32.mrf.mxu1 }
 0x415   :  { %v1356_v53 = vadd.f32 %v1343_v24, %v1202_v23 }
 0x417   :  { %v1361_v27 = vadd.f32 %v1356_v53, %v1355_v26 }
 0x419   :  { %v1362_v55 = vadd.f32 %v1361_v27, %v1357_v9 }
 0x41b   :  { %v1363_v56 = vadd.f32 %v1362_v55, %v1358_v54 }
 0x41d   :  { %v1364_v57 = vrot.slane %v1363_v56, 4 }
 0x41f   :  { %v1365_v58 = vadd.f32 %v1364_v57, %v1363_v56 }
 0x421   :  { %v1366_v59 = vrot.slane %v1365_v58, 2 }
 0x423   :  { %v1367_v61 = vadd.f32 %v1366_v59, %v1365_v58 }
 0x425   :  { %v1368_v62 = vrot.slane %v1367_v61, 1 }
 0x427   :  { %v1369_v0 = vadd.f32 %v1368_v62, %v1367_v61 }
 0x429   :  { %2040 = vmatmul.mubr.f32.vlgmr.msra.gmra.mxu0 %v1369_v0 }
 0x4e9   :  { %v1452_v1 = vpop.f32.mrf.mxu0 }
 0x4ea   :  { %v1456_v4 = vmul.f32 0.001953125, %v1452_v1 }
 0x4eb   :  { %v2041_v2 = vpop.f32.mrf.mxu0 }
 0x4ec   :  { %v1460_v10 = vrot.slane %v1456_v4, %v2521_v63 }
 0x4ee   :  { %v1461_v28 = vsub.f32 %v1355_v26, %v1460_v10  ;;  %v1462_v29 = vsub.f32 %v1356_v53, %v1460_v10  ;;  %v1463_v31 = vsub.f32 %v1357_v9, %v1460_v10  ;;  %v1464_v32 = vsub.f32 %v1358_v54, %v1460_v10 }
 0x4f0   :  { %v1465_v33 = vmul.f32 %v1461_v28, %v1461_v28  ;;  %v1466_v34 = vmul.f32 %v1462_v29, %v1462_v29  ;;  %v1467_v35 = vmul.f32 %v1463_v31, %v1463_v31  ;;  %v1468_v37 = vmul.f32 %v1464_v32, %v1464_v32 }
 0x4f2   :  { %v1469_v36 = vadd.f32 %v1466_v34, %v1465_v33 }
 0x4f4   :  { %v1470_v3 = vadd.f32 %v1469_v36, %v1467_v35 }
 0x4f6   :  { %v1471_v40 = vadd.f32 %v1470_v3, %v1468_v37 }
 0x4f8   :  { %v1472_v42 = vrot.slane %v1471_v40, 4 }
 0x4fa   :  { %v1473_v39 = vadd.f32 %v1472_v42, %v1471_v40 }
 0x4fc   :  { %v1474_v43 = vrot.slane %v1473_v39, 2 }
 0x4fe   :  { %v1475_v41 = vadd.f32 %v1474_v43, %v1473_v39 }
 0x500   :  { %v1476_v44 = vrot.slane %v1475_v41, 1 }
 0x502   :  { %v1477_v30 = vadd.f32 %v1476_v44, %v1475_v41 }
 0x504   :  { %2075 = vmatmul.mubr.f32.vlgmr.msra.gmra.mxu1 %v1477_v30 }
 0x5c4   :  { %v1544_v47 = vpop.f32.mrf.mxu1 }
 0x5c5   :  { %v1548_v60 = vmul.f32 0.001953125, %v1544_v47 }
 0x5c6   :  { %v2076_v46 = vpop.f32.mrf.mxu1 }
 0x5c7   :  { %v1549_v8 = vadd.f32 1e-05, %v1548_v60 }
 0x5c9   :  { %2142 = vrsqrt.f32 %v1549_v8 }
 0x5d6   :  { %v2143_v49 = vpop.eup %2142 }
 0x5d7   :  { %v1551_v50 = vmul.f32 %v2143_v49, %v1359_v48 }
 0x5d9   :  { %v1556_v5 = vrot.slane %v1551_v50, %v2521_v63 }
 0x5db   :  { %v1558_v6 = vmul.f32 %v1556_v5, %v1461_v28  ;;  %v1559_v52 = vmul.f32 %v1556_v5, %v1462_v29  ;;  %v1560_v45 = vmul.f32 %v1556_v5, %v1463_v31  ;;  %v1561_v7 = vmul.f32 %v1556_v5, %v1464_v32 }
 0x5dd   :  { %v1568_v15 = vadd.f32 %v1680_v51, %v1558_v6  ;;  %v1569_v16 = vadd.f32 %v1680_v51, %v1559_v52  ;;  %v1570_v17 = vadd.f32 %v1680_v51, %v1560_v45  ;;  %v1571_v18 = vadd.f32 %v1680_v51, %v1561_v7 }
 0x5df   :  { %v1576_v19 = vadd.f32 %v1572_v38, %v1568_v15  ;;  %v1577_v63 = vadd.f32 %v1573_v11, %v1569_v16  ;;  %v1578_v20 = vadd.f32 %v1574_v13, %v1570_v17  ;;  %v1579_v21 = vadd.f32 %v1575_v14, %v1571_v18 }
 0x5e1   :  { %v1580_v22 = vmax.f32 %v1576_v19, 0.0  ;;  %v1581_v23 = vmax.f32 %v1577_v63, 0.0  ;;  %v1582_v24 = vmax.f32 %v1578_v20, 0.0  ;;  %v1583_v25 = vmax.f32 %v1579_v21, 0.0 }
 0x5e3   :  { %1584 = vst [vmem:[#allocation11] sm:$0xff] %v1580_v22  ;;  %1585 = vst [vmem:[#allocation11 + $0x8] sm:$0xff] %v1581_v23 }
 0x5e4   :  { %1586 = vst [vmem:[#allocation11 + $0x10] sm:$0xff] %v1582_v24  ;;  %1587 = vst [vmem:[#allocation11 + $0x18] sm:$0xff] %v1583_v25 }
 0x5e5   :  { %2235 = shalt.err (!%p2232_p10)
}
 0x5e6   :  { %1599 = dma.vmem_to_hbm [thread:$0]  %s1594_s9, 512, %s2684_s8, [#allocation5], %s2256_s15, %s2256_s15, %s2257_s16  }
 0x5e7   :  { %2250 = dma.done.wait [#allocation5], 512  }
 0x5e8   :  { %2251 = vsyncadd [#allocation5], 4294966784 }
 0x5e9   :  { %1603 = vsyncpa [#allocation4], 1 }
 0x5ea   :  { %1604 = vsyncpa [#allocation7], 1 }
 0x5eb   :  { %1605 = vsyncpa [#allocation10], 1 }
 0x5ec   :  { %1606 = vsyncpa [#allocation5], 1 }

</bundles_post_ra>
